<compile_context>
chip_gen: v6e
topology: v6e:2x2x1
jax: 0.10.0
libtpu: 0.0.40
codegen_flags: <defaults>
</compile_context>

<pallas_src>
import jax
import jax.numpy as jnp
from jax.experimental import pallas as pl
from jax.experimental.pallas import tpu as pltpu


def _round_up(x, m):
    return ((x + m - 1) // m) * m


def actor_kernel(x_ref, w1_ref, b1_ref, w2_ref, b2_ref, wm_ref, bm_ref,
                 mean_ref):
    # Hot path: three matmuls (MXU) + tanh (EUP), all operands resident in VMEM.
    x = x_ref[...]
    h1 = jnp.tanh(
        jnp.dot(x, w1_ref[...], preferred_element_type=jnp.float32)
        + b1_ref[...])
    h2 = jnp.tanh(
        jnp.dot(h1, w2_ref[...], preferred_element_type=jnp.float32)
        + b2_ref[...])
    mean = (jnp.dot(h2, wm_ref[...], preferred_element_type=jnp.float32)
            + bm_ref[...])
    mean_ref[...] = mean.astype(mean_ref.dtype)


def actor_forward(state, params, *, block_b=None):
    """Run the actor MLP forward pass. Returns (mean, std)."""
    w1, b1, w2, b2, wm, bm, log_std = params
    B, state_dim = state.shape
    h1_dim = w1.shape[1]
    h2_dim = w2.shape[1]
    action_dim = wm.shape[1]

    # --- lane-dense output: pad final-layer N dim (action_dim) up to 128 ---
    n_pad = _round_up(action_dim, 128)
    if n_pad != action_dim:
        wm_p = jnp.pad(wm, ((0, 0), (0, n_pad - action_dim)))
        bm_p = jnp.pad(bm, ((0, 0), (0, n_pad - action_dim)))
    else:
        wm_p, bm_p = wm, bm

    # --- big batch tile: whole batch if small, else capped; multiple of 8 ---
    if block_b is None:
        block_b = min(_round_up(B, 8), 512)
    block_b = _round_up(block_b, 8)

    B_pad = _round_up(B, block_b)
    if B_pad != B:
        state = jnp.pad(state, ((0, B_pad - B), (0, 0)))

    grid = (B_pad // block_b,)

    kernel = pl.pallas_call(
        actor_kernel,
        out_shape=jax.ShapeDtypeStruct((B_pad, n_pad), jnp.float32),
        grid_spec=pl.GridSpec(
            grid=grid,
            in_specs=[
                pl.BlockSpec((block_b, state_dim), lambda i: (i, 0)),  # state
                pl.BlockSpec((state_dim, h1_dim), lambda i: (0, 0)),   # W1
                pl.BlockSpec((1, h1_dim), lambda i: (0, 0)),           # b1
                pl.BlockSpec((h1_dim, h2_dim), lambda i: (0, 0)),      # W2
                pl.BlockSpec((1, h2_dim), lambda i: (0, 0)),           # b2
                pl.BlockSpec((h2_dim, n_pad), lambda i: (0, 0)),       # Wm (padded)
                pl.BlockSpec((1, n_pad), lambda i: (0, 0)),            # bm (padded)
            ],
            out_specs=pl.BlockSpec((block_b, n_pad), lambda i: (i, 0)),
        ),
        compiler_params=pltpu.CompilerParams(
            dimension_semantics=("parallel",)),
    )
    mean_padded = kernel(state, w1, b1, w2, b2, wm_p, bm_p)
    mean = mean_padded[:B, :action_dim]

    # std does not depend on the batch: compute exp(log_std) once here and
    # broadcast, instead of re-doing it (and a full output DMA) per grid step.
    std = jnp.broadcast_to(jnp.exp(log_std), mean.shape)
    return mean, std


def init_params(key, state_dim, action_dim, hidden_dims=(128, 64)):
    """Deterministic init mimicking nn.Linear default (uniform +-1/sqrt(fan_in))."""
    params = []
    dims = [state_dim, *hidden_dims, action_dim]
    keys = jax.random.split(key, len(dims) - 1)
    for k, (din, dout) in zip(keys, zip(dims[:-1], dims[1:])):
        bound = 1.0 / jnp.sqrt(jnp.float32(din))
        kw, kb = jax.random.split(k)
        # stored as (in, out) == transpose of PyTorch's (out, in)
        w = jax.random.uniform(kw, (din, dout), jnp.float32, -bound, bound)
        b = jax.random.uniform(kb, (1, dout), jnp.float32, -bound, bound)
        params.extend([w, b])
    log_std = jnp.zeros((1, action_dim), jnp.float32)  # nn.Parameter(zeros)
    return tuple(params) + (log_std,)


def actor_reference(state, params):
    """Pure-JAX reference for correctness check."""
    w1, b1, w2, b2, wm, bm, log_std = params
    h1 = jnp.tanh(state @ w1 + b1)
    h2 = jnp.tanh(h1 @ w2 + b2)
    mean = h2 @ wm + bm
    std = jnp.broadcast_to(jnp.exp(log_std), mean.shape)
    return mean, std


if __name__ == "__main__":
    key = jax.random.PRNGKey(0)
    k_param, k_state = jax.random.split(key)

    state_dim, action_dim = 8, 4
    batch = 16  # small demo batch; wrapper handles padding / tiling for any B

    params = init_params(k_param, state_dim, action_dim, hidden_dims=(128, 64))
    state = jax.random.normal(k_state, (batch, state_dim), jnp.float32)

    mean, std = actor_forward(state, params)
    jax.block_until_ready((mean, std))

    mean_ref, std_ref = actor_reference(state, params)
    assert mean.shape == mean_ref.shape and std.shape == std_ref.shape
    assert jnp.allclose(mean, mean_ref, atol=1e-5, rtol=1e-5)
    assert jnp.allclose(std, std_ref, atol=1e-6, rtol=1e-6)

    print("KERNEL_OK")
</pallas_src>

<mosaic_0001>
module attributes {stable_mosaic.version = 11 : i64} {
  func.func @actor_kernel(%arg0: i32, %arg1: memref<16x8xf32, #tpu.memory_space<vmem>>, %arg2: memref<8x128xf32, #tpu.memory_space<vmem>>, %arg3: memref<1x128xf32, #tpu.memory_space<vmem>>, %arg4: memref<128x64xf32, #tpu.memory_space<vmem>>, %arg5: memref<1x64xf32, #tpu.memory_space<vmem>>, %arg6: memref<64x128xf32, #tpu.memory_space<vmem>>, %arg7: memref<1x128xf32, #tpu.memory_space<vmem>>, %arg8: memref<16x128xf32, #tpu.memory_space<vmem>>) attributes {dimension_semantics = [#tpu.dimension_semantics<parallel>], iteration_bounds = array<i64: 1>, scalar_prefetch = 0 : i64, scratch_operands = 0 : i64, tpu.core_type = #tpu.core_type<tc>, window_params = [{transform_indices = @transform_0, window_bounds = array<i64: 16, 8>}, {pipeline_mode = #tpu.pipeline_mode<synchronous>, transform_indices = @transform_1, window_bounds = array<i64: 8, 128>}, {pipeline_mode = #tpu.pipeline_mode<synchronous>, transform_indices = @transform_2, window_bounds = array<i64: 1, 128>}, {pipeline_mode = #tpu.pipeline_mode<synchronous>, transform_indices = @transform_3, window_bounds = array<i64: 128, 64>}, {pipeline_mode = #tpu.pipeline_mode<synchronous>, transform_indices = @transform_4, window_bounds = array<i64: 1, 64>}, {pipeline_mode = #tpu.pipeline_mode<synchronous>, transform_indices = @transform_5, window_bounds = array<i64: 64, 128>}, {pipeline_mode = #tpu.pipeline_mode<synchronous>, transform_indices = @transform_6, window_bounds = array<i64: 1, 128>}, {transform_indices = @transform_7, window_bounds = array<i64: 16, 128>}]} {
    %c0 = arith.constant 0 : index
    %c0_0 = arith.constant 0 : index
    %0 = vector.load %arg1[%c0, %c0_0] : memref<16x8xf32, #tpu.memory_space<vmem>>, vector<16x8xf32>
    %c0_1 = arith.constant 0 : index
    %c0_2 = arith.constant 0 : index
    %1 = vector.load %arg2[%c0_1, %c0_2] : memref<8x128xf32, #tpu.memory_space<vmem>>, vector<8x128xf32>
    %cst = arith.constant dense<0.000000e+00> : vector<16x128xf32>
    %2 = tpu.matmul %0, %1, %cst {dimension_numbers = #tpu.dot_dimension_numbers<[1], [0], [0], [1], [0, 0, 1, 1], [], []>} : vector<16x8xf32>, vector<8x128xf32>, vector<16x128xf32> -> vector<16x128xf32>
    %c0_3 = arith.constant 0 : index
    %c0_4 = arith.constant 0 : index
    %3 = vector.load %arg3[%c0_3, %c0_4] : memref<1x128xf32, #tpu.memory_space<vmem>>, vector<1x128xf32>
    %4 = vector.broadcast %3 : vector<1x128xf32> to vector<16x128xf32>
    %5 = arith.addf %2, %4 : vector<16x128xf32>
    %6 = math.tanh %5 : vector<16x128xf32>
    %c0_5 = arith.constant 0 : index
    %c0_6 = arith.constant 0 : index
    %7 = vector.load %arg4[%c0_5, %c0_6] : memref<128x64xf32, #tpu.memory_space<vmem>>, vector<128x64xf32>
    %cst_7 = arith.constant dense<0.000000e+00> : vector<16x64xf32>
    %8 = tpu.matmul %6, %7, %cst_7 {dimension_numbers = #tpu.dot_dimension_numbers<[1], [0], [0], [1], [0, 0, 1, 1], [], []>} : vector<16x128xf32>, vector<128x64xf32>, vector<16x64xf32> -> vector<16x64xf32>
    %c0_8 = arith.constant 0 : index
    %c0_9 = arith.constant 0 : index
    %9 = vector.load %arg5[%c0_8, %c0_9] : memref<1x64xf32, #tpu.memory_space<vmem>>, vector<1x64xf32>
    %10 = vector.broadcast %9 : vector<1x64xf32> to vector<16x64xf32>
    %11 = arith.addf %8, %10 : vector<16x64xf32>
    %12 = math.tanh %11 : vector<16x64xf32>
    %c0_10 = arith.constant 0 : index
    %c0_11 = arith.constant 0 : index
    %13 = vector.load %arg6[%c0_10, %c0_11] : memref<64x128xf32, #tpu.memory_space<vmem>>, vector<64x128xf32>
    %cst_12 = arith.constant dense<0.000000e+00> : vector<16x128xf32>
    %14 = tpu.matmul %12, %13, %cst_12 {dimension_numbers = #tpu.dot_dimension_numbers<[1], [0], [0], [1], [0, 0, 1, 1], [], []>} : vector<16x64xf32>, vector<64x128xf32>, vector<16x128xf32> -> vector<16x128xf32>
    %c0_13 = arith.constant 0 : index
    %c0_14 = arith.constant 0 : index
    %15 = vector.load %arg7[%c0_13, %c0_14] : memref<1x128xf32, #tpu.memory_space<vmem>>, vector<1x128xf32>
    %16 = vector.broadcast %15 : vector<1x128xf32> to vector<16x128xf32>
    %17 = arith.addf %14, %16 : vector<16x128xf32>
    %c0_15 = arith.constant 0 : index
    %c0_16 = arith.constant 0 : index
    %18 = vector.load %arg8[%c0_15, %c0_16] : memref<16x128xf32, #tpu.memory_space<vmem>>, vector<16x128xf32>
    tpu.vector_store %arg8[%c0_15, %c0_16], %17 {strides = array<i32>} : memref<16x128xf32, #tpu.memory_space<vmem>>, vector<16x128xf32>,
    return
  }
  func.func @transform_0(%arg0: i32) -> (i32, i32) {
    %c0_i32 = arith.constant 0 : i32
    %c0_i32_0 = arith.constant 0 : i32
    return %arg0, %c0_i32 : i32, i32
  }
  func.func @transform_1(%arg0: i32) -> (i32, i32) {
    %c0_i32 = arith.constant 0 : i32
    %c0_i32_0 = arith.constant 0 : i32
    %c0_i32_1 = arith.constant 0 : i32
    return %c0_i32, %c0_i32_0 : i32, i32
  }
  func.func @transform_2(%arg0: i32) -> (i32, i32) {
    %c0_i32 = arith.constant 0 : i32
    %c0_i32_0 = arith.constant 0 : i32
    %c0_i32_1 = arith.constant 0 : i32
    return %c0_i32, %c0_i32_0 : i32, i32
  }
  func.func @transform_3(%arg0: i32) -> (i32, i32) {
    %c0_i32 = arith.constant 0 : i32
    %c0_i32_0 = arith.constant 0 : i32
    %c0_i32_1 = arith.constant 0 : i32
    return %c0_i32, %c0_i32_0 : i32, i32
  }
  func.func @transform_4(%arg0: i32) -> (i32, i32) {
    %c0_i32 = arith.constant 0 : i32
    %c0_i32_0 = arith.constant 0 : i32
    %c0_i32_1 = arith.constant 0 : i32
    return %c0_i32, %c0_i32_0 : i32, i32
  }
  func.func @transform_5(%arg0: i32) -> (i32, i32) {
    %c0_i32 = arith.constant 0 : i32
    %c0_i32_0 = arith.constant 0 : i32
    %c0_i32_1 = arith.constant 0 : i32
    return %c0_i32, %c0_i32_0 : i32, i32
  }
  func.func @transform_6(%arg0: i32) -> (i32, i32) {
    %c0_i32 = arith.constant 0 : i32
    %c0_i32_0 = arith.constant 0 : i32
    %c0_i32_1 = arith.constant 0 : i32
    return %c0_i32, %c0_i32_0 : i32, i32
  }
  func.func @transform_7(%arg0: i32) -> (i32, i32) {
    %c0_i32 = arith.constant 0 : i32
    %c0_i32_0 = arith.constant 0 : i32
    return %arg0, %c0_i32 : i32, i32
  }
}

</mosaic_0001>

<bundles_post_ra>
// kernel: tpu_custom_call.1
= control target key start
LH: loop header
LB: loop body
LE: loop exit
PB: predicated region body
PF: predicated region fallthrough
CT: control target
= control target key end

     0   :  { %vm37_vm0 = vcmask 64512   ;;  %s602_s0 = inlined_call_operand.vmem [shape: f32[16,8], index: 0, kind: input, shape index: {}]   ;;  %s603_s1 = inlined_call_operand.vmem [shape: f32[8,128], index: 1, kind: input, shape index: {}]   ;;  %s604_s2 = inlined_call_operand.vmem [shape: f32[1,128], index: 2, kind: input, shape index: {}]   ;;  %s605_s3 = inlined_call_operand.vmem [shape: f32[128,64], index: 3, kind: input, shape index: {}]   ;;  %s606_s4 = inlined_call_operand.vmem [shape: f32[1,64], index: 4, kind: input, shape index: {}]   ;;  %s607_s5 = inlined_call_operand.vmem [shape: f32[64,128], index: 5, kind: input, shape index: {}]   ;;  %s608_s6 = inlined_call_operand.vmem [shape: f32[1,128], index: 6, kind: input, shape index: {}]   ;;  %s609_s7 = inlined_call_operand.hbm [shape: f32[16,128], index: 7, kind: output, shape index: {}]  }
   0x1   :  { %v29_v0 = vld [vmem:[%s603_s1] sm:$0xff]  ;;  %v28_v2 = vld [vmem:[%s602_s0 + $0x8] sm:$0xff]  ;;  %v136_v3 = vld [vmem:[%s605_s3 + $0x78] sm:$0xff] }
   0x2   :  { %v27_v1 = vld [vmem:[%s602_s0] sm:$0xff]  ;;  %374 = vmatprep.subr.mxu0 %v29_v0  ;;  %v135_v4 = vld [vmem:[%s605_s3 + $0x70] sm:$0xff]  ;;  %379 = vmatprep.subr.mxu1 %v136_v3  ;;  %v134_v5 = vld [vmem:[%s605_s3 + $0x68] sm:$0xff] }
   0x3   :  { %376 = vmatprep.mubr.msk.f32.mxu0 %vm37_vm0, %v27_v1  ;;  %375 = vmatpush3.msra.mxu0 %v29_v0 }
   0x4   :  { %377 = vmatmul.mubr.msk.f32.vlgmr.msra.gmra.mxu0 %vm37_vm0, %v28_v2  ;;  %380 = vmatpush3.msra.mxu1 %v136_v3 }
   0x5   :  { %12 = vsyncpa [#allocation3], 0  ;;  %381 = vmatprep.subr.mxu1 %v135_v4  ;;  %v133_v6 = vld [vmem:[%s605_s3 + $0x60] sm:$0xff]  ;;  %v132_v7 = vld [vmem:[%s605_s3 + $0x58] sm:$0xff]  ;;  %vm236_vm1 = vcmask 523264   ;;  %s466_s8 = smov [#allocation2]  }
   0x6   :  { %382 = vmatpush3.msra.mxu1 %v135_v4  ;;  %v131_v8 = vld [vmem:[%s605_s3 + $0x50] sm:$0xff]  ;;  %v130_v9 = vld [vmem:[%s605_s3 + $0x48] sm:$0xff]  ;;  %v129_v10 = vld [vmem:[%s605_s3 + $0x40] sm:$0xff]  ;;  %s325_s9 = sshll.u32 %s466_s8, 4  ;;  %s326_s9 = int_to_ptr.vmem [resolvable:$true] %s325_s9 }
   0x7   :  { %383 = vmatprep.subr.mxu1 %v134_v5  ;;  %v128_v11 = vld [vmem:[%s605_s3 + $0x38] sm:$0xff]  ;;  %v127_v12 = vld [vmem:[%s605_s3 + $0x30] sm:$0xff]  ;;  %v126_v13 = vld [vmem:[%s605_s3 + $0x28] sm:$0xff]  ;;  %p449_p1 = scmp.lt.s32.totalorder %s326_s9, %s326_s9 }
   0x8   :  { %384 = vmatpush3.msra.mxu1 %v134_v5  ;;  %v125_v14 = vld [vmem:[%s605_s3 + $0x20] sm:$0xff]  ;;  %v124_v15 = vld [vmem:[%s605_s3 + $0x18] sm:$0xff]  ;;  %v123_v16 = vld [vmem:[%s605_s3 + $0x10] sm:$0xff] }
   0x9   :  { %385 = vmatprep.subr.mxu1 %v133_v6  ;;  %v122_v17 = vld [vmem:[%s605_s3 + $0x8] sm:$0xff]  ;;  %v121_v18 = vld [vmem:[%s605_s3] sm:$0xff]  ;;  %v228_v26 = vld [vmem:[%s607_s5 + $0x38] sm:$0xff] }
   0xa   :  { %386 = vmatpush3.msra.mxu1 %v133_v6  ;;  %v336_v19 = vld [vmem:[%s604_s2] ss:$0 sm:$0xff]  ;;  %414 = vmatprep.subr.mxu0 %v228_v26  ;;  %v227_v27 = vld [vmem:[%s607_s5 + $0x30] sm:$0xff]  ;;  %v226_v28 = vld [vmem:[%s607_s5 + $0x28] sm:$0xff] }
   0xb   :  { %387 = vmatprep.subr.mxu1 %v132_v7  ;;  %415 = vmatpush3.msra.mxu0 %v228_v26  ;;  %v225_v29 = vld [vmem:[%s607_s5 + $0x20] sm:$0xff]  ;;  %v224_v30 = vld [vmem:[%s607_s5 + $0x18] sm:$0xff]  ;;  %v223_v31 = vld [vmem:[%s607_s5 + $0x10] sm:$0xff] }
   0xc   :  { %388 = vmatpush3.msra.mxu1 %v132_v7  ;;  %416 = vmatprep.subr.mxu0 %v227_v27  ;;  %v222_v32 = vld [vmem:[%s607_s5 + $0x8] sm:$0xff]  ;;  %v221_v33 = vld [vmem:[%s607_s5] sm:$0xff] }
   0xd   :  { %389 = vmatprep.subr.mxu1 %v131_v8  ;;  %417 = vmatpush3.msra.mxu0 %v227_v27  ;;  %v339_v34 = vld [vmem:[%s606_s4] ss:$0 sm:$0xff]  ;;  %s444_s4 = scalar_lea.vmem %s326_s9, 256 }
   0xe   :  { %390 = vmatpush3.msra.mxu1 %v131_v8  ;;  %418 = vmatprep.subr.mxu0 %v226_v28  ;;  %v340_v41 = vld [vmem:[%s608_s6] ss:$0 sm:$0xff]  ;;  %p445_p0 = scmp.ne.s32.totalorder %s326_s9, %s444_s4  ;;  %p450_p2 = scmp.lt.s32.totalorder %s444_s4, %s444_s4 }
   0xf   :  { %391 = vmatprep.subr.mxu1 %v130_v9  ;;  %419 = vmatpush3.msra.mxu0 %v226_v28 }
  0x10   :  { %392 = vmatpush3.msra.mxu1 %v130_v9  ;;  %420 = vmatprep.subr.mxu0 %v225_v29  ;;  %p451_p3 = por %p450_p2, %p449_p1 }
  0x11   :  { %393 = vmatprep.subr.mxu1 %v129_v10  ;;  %421 = vmatpush3.msra.mxu0 %v225_v29 }
  0x12   :  { %394 = vmatpush3.msra.mxu1 %v129_v10  ;;  %422 = vmatprep.subr.mxu0 %v224_v30  ;;  %p452_p4 = pnand %p451_p3, %p445_p0 }
  0x13   :  { %395 = vmatprep.subr.mxu1 %v128_v11  ;;  %423 = vmatpush3.msra.mxu0 %v224_v30 }
  0x14   :  { %396 = vmatpush3.msra.mxu1 %v128_v11  ;;  %424 = vmatprep.subr.mxu0 %v223_v31 }
  0x15   :  { %397 = vmatprep.subr.mxu1 %v127_v12  ;;  %425 = vmatpush3.msra.mxu0 %v223_v31 }
  0x16   :  { %398 = vmatpush3.msra.mxu1 %v127_v12  ;;  %426 = vmatprep.subr.mxu0 %v222_v32 }
  0x17   :  { %399 = vmatprep.subr.mxu1 %v126_v13  ;;  %427 = vmatpush3.msra.mxu0 %v222_v32 }
  0x18   :  { %400 = vmatpush3.msra.mxu1 %v126_v13  ;;  %428 = vmatprep.subr.mxu0 %v221_v33 }
  0x19   :  { %401 = vmatprep.subr.mxu1 %v125_v14  ;;  %429 = vmatpush3.msra.mxu0 %v221_v33 }
  0x1a   :  { %402 = vmatpush3.msra.mxu1 %v125_v14 }
  0x1b   :  { %403 = vmatprep.subr.mxu1 %v124_v15 }
  0x1c   :  { %404 = vmatpush3.msra.mxu1 %v124_v15 }
  0x1d   :  { %405 = vmatprep.subr.mxu1 %v123_v16 }
  0x1e   :  { %406 = vmatpush3.msra.mxu1 %v123_v16 }
  0x1f   :  { %407 = vmatprep.subr.mxu1 %v122_v17 }
  0x20   :  { %408 = vmatpush3.msra.mxu1 %v122_v17 }
  0x21   :  { %409 = vmatprep.subr.mxu1 %v121_v18 }
  0x22   :  { %410 = vmatpush3.msra.mxu1 %v121_v18 }
  0xc4   :  { %v378_v20 = vpop.f32.mrf.mxu0 }
  0xc5   :  { %v116_v21 = vadd.f32 %v378_v20, %v336_v19 }
  0xc6   :  { %v110_v22 = vpop.f32.mrf.mxu0 }
  0xc7   :  { %v111_v23 = vadd.f32 %v336_v19, %v110_v22 }
  0xc9   :  { %436 = vtanh.f32 %v111_v23 }
  0xca   :  { %438 = vtanh.f32 %v116_v21 }
  0xd6   :  { %v437_v24 = vpop.eup %436 }
  0xd7   :  { %v439_v25 = vpop.eup %438  ;;  %411 = vmatprep.mubr.f32.mxu1 %v437_v24 }
  0xd8   :  { %412 = vmatmul.mubr.f32.vlgmr.msra.gmra.mxu1 %v439_v25 }
 0x198   :  { %v413_v35 = vpop.f32.mrf.mxu1 }
 0x199   :  { %v216_v36 = vadd.f32 %v413_v35, %v339_v34 }
 0x19a   :  { %v210_v37 = vpop.f32.mrf.mxu1 }
 0x19b   :  { %v211_v38 = vadd.f32 %v339_v34, %v210_v37 }
 0x19d   :  { %440 = vtanh.f32 %v211_v38 }
 0x19e   :  { %442 = vtanh.f32 %v216_v36 }
 0x1aa   :  { %v441_v39 = vpop.eup %440 }
 0x1ab   :  { %v443_v40 = vpop.eup %442  ;;  %430 = vmatprep.mubr.msk.f32.mxu0 %vm236_vm1, %v441_v39 }
 0x1ac   :  { %431 = vmatmul.mubr.msk.f32.vlgmr.msra.gmra.mxu0 %vm236_vm1, %v443_v40 }
 0x26c   :  { %v432_v42 = vpop.f32.mrf.mxu0 }
 0x26d   :  { %v315_v43 = vadd.f32 %v432_v42, %v340_v41 }
 0x26e   :  { %v309_v44 = vpop.f32.mrf.mxu0 }
 0x26f   :  { %319 = vst [vmem:[#allocation2 + $0x8] sm:$0xff] %v315_v43  ;;  %v310_v45 = vadd.f32 %v340_v41, %v309_v44 }
 0x271   :  { %318 = vst [vmem:[#allocation2] sm:$0xff] %v310_v45 }
 0x272   :  { %455 = shalt.err (!%p452_p4)
}
 0x273   :  { %s467_s10 = smov 128   ;;  %s468_s1 = smov 8  }
 0x274   :  { %331 = dma.vmem_to_hbm [thread:$0]  %s326_s9, 256, %s609_s7, [#allocation3], %s467_s10, %s467_s10, %s468_s1  }
 0x275   :  { %464 = dma.done.wait [#allocation3], 256  }
 0x276   :  { %465 = vsyncadd [#allocation3], 4294967040 }
 0x277   :  { %335 = vsyncpa [#allocation3], 1 }

</bundles_post_ra>
